<compile_context>
chip_gen: v7x
topology: tpu7x:2x2x1
jax: 0.10.0
libtpu: 0.0.40
codegen_flags: <defaults>
</compile_context>

<pallas_src>
import functools

import jax
import jax.numpy as jnp
from jax.experimental import pallas as pl
from jax.experimental.pallas import tpu as pltpu

_BF16 = jnp.bfloat16
_BN_EPS = 1e-5
_VMEM_LIMIT = 32 * 1024 * 1024


# ---------------------------------------------------------------------------
# Kernel 1: merged (lane-dense) matmul + bias
# ---------------------------------------------------------------------------
def _mm_bias_kernel(x_ref, w_ref, b_ref, o_ref):
    o_ref[...] = jnp.dot(x_ref[...], w_ref[...],
                         preferred_element_type=jnp.float32) + b_ref[...]


def matmul_bias(x, w, b):
    """Y = X @ W + b.  X:(M,K), W:(K,N).  bf16 operands, f32 accumulation.
    N is expected to be a multiple of 128 (lane-dense stores)."""
    m, k = x.shape
    n = w.shape[1]
    return pl.pallas_call(
        _mm_bias_kernel,
        out_shape=jax.ShapeDtypeStruct((m, n), jnp.float32),
        grid=(1,),
        in_specs=[pl.BlockSpec((m, k), lambda i: (0, 0)),
                  pl.BlockSpec((k, n), lambda i: (0, 0)),
                  pl.BlockSpec((1, n), lambda i: (0, 0))],
        out_specs=pl.BlockSpec((m, n), lambda i: (0, 0)),
        compiler_params=pltpu.CompilerParams(
            dimension_semantics=("arbitrary",),
            vmem_limit_bytes=_VMEM_LIMIT),
    )(x.astype(_BF16), w.astype(_BF16), b.reshape(1, n).astype(jnp.float32))


# ---------------------------------------------------------------------------
# Kernel 2: fused pixel-path mega-kernel
#   frame conv3x3+BN+ReLU (+mean over T), ms 1x1+BN, hier (pre-composed)
#   1x1+BN, adapt 1x1, final conv3x3+BN+ReLU, final 1x1+BN — all in VMEM.
# ---------------------------------------------------------------------------
def _pixel_path_kernel(xf_ref, ms_ref, hr_ref, ad_ref, wc_ref, w1_ref,
                       pc_ref, p2_ref, o_ref,
                       pad_f, pad_c, colsf, cols1, comb_scr,
                       *, dims, eps):
    b, t, h, w, c = dims
    p = b * h * w          # pixels per (B,H,W) map
    mf = t * p             # pixels over all frames
    bf16 = jnp.bfloat16

    pc = pc_ref[...]       # (13, C)  f32: [bf,gf,btf, bm,gm,btm, bh,gh,bth, ba, b2,g2,bt2]
    p2 = p2_ref[...]       # (3, 2C)  f32: [b1,g1,bt1]

    def bn(y, params, gi, bi):
        # training-mode BatchNorm, centered second moment (f32).
        mean = jnp.mean(y, axis=0, keepdims=True)
        var = jnp.mean((y - mean) ** 2, axis=0, keepdims=True)
        return (y - mean) * (params[gi:gi + 1, :] * jax.lax.rsqrt(var + eps)) \
            + params[bi:bi + 1, :]

    # ---- frame level: conv3x3 + BN + ReLU over all T*B frames, mean over T --
    pad_f[...] = jnp.zeros_like(pad_f)
    pad_f[:, 1:1 + h, 1:1 + w, :] = xf_ref[...]
    for j in range(9):                       # in-VMEM im2col (K = 9*C)
        ky, kx = j // 3, j % 3
        colsf[:, j * c:(j + 1) * c] = \
            pad_f[:, ky:ky + h, kx:kx + w, :].reshape(mf, c)
    yf = jnp.dot(colsf[...], wc_ref[0:9 * c, :],
                 preferred_element_type=jnp.float32) + pc[0:1, :]
    yf = jnp.maximum(bn(yf, pc, 1, 2), 0.0)                    # (mf, C)
    frame_feat = yf[0:p, :]
    for ti in range(1, t):                   # mean over T (rows are t-major)
        frame_feat = frame_feat + yf[ti * p:(ti + 1) * p, :]
    frame_feat = frame_feat * (1.0 / t)                        # (p, C)

    # ---- multiscale fusion: conv1x1 + BN -------------------------------------
    ym = jnp.dot(ms_ref[...], wc_ref[9 * c:12 * c, :],
                 preferred_element_type=jnp.float32) + pc[3:4, :]
    ms_out = bn(ym, pc, 4, 5)                                  # (p, C)

    # ---- hierarchical fusion (pre-composed hierarchy+final 1x1) + BN --------
    yh = (jnp.dot(frame_feat.astype(bf16), wc_ref[12 * c:13 * c, :],
                  preferred_element_type=jnp.float32)
          + jnp.dot(hr_ref[...], wc_ref[13 * c:15 * c, :],
                    preferred_element_type=jnp.float32)
          + pc[6:7, :])
    hier_out = bn(yh, pc, 7, 8)                                # (p, C)

    # ---- adaptive pooling fusion: conv1x1 ------------------------------------
    adapt_out = jnp.dot(ad_ref[...], wc_ref[15 * c:16 * c, :],
                        preferred_element_type=jnp.float32) + pc[9:10, :]

    # ---- final fusion: conv3x3 + BN + ReLU -> conv1x1 + BN -------------------
    comb_scr[:, 0 * c:1 * c] = ms_out.astype(bf16)
    comb_scr[:, 1 * c:2 * c] = hier_out.astype(bf16)
    comb_scr[:, 2 * c:3 * c] = adapt_out.astype(bf16)
    pad_c[...] = jnp.zeros_like(pad_c)
    for bi in range(b):
        for hi in range(h):
            r0 = (bi * h + hi) * w
            pad_c[bi, hi + 1, 1:1 + w, :] = comb_scr[r0:r0 + w, :]
    for j in range(9):                       # im2col (K = 27*C)
        ky, kx = j // 3, j % 3
        cols1[:, j * 3 * c:(j + 1) * 3 * c] = \
            pad_c[:, ky:ky + h, kx:kx + w, :].reshape(p, 3 * c)
    y1 = jnp.dot(cols1[...], w1_ref[...],
                 preferred_element_type=jnp.float32) + p2[0:1, :]
    y1 = jnp.maximum(bn(y1, p2, 1, 2), 0.0)                    # (p, 2C)
    y2 = jnp.dot(y1.astype(bf16), wc_ref[16 * c:18 * c, :],
                 preferred_element_type=jnp.float32) + pc[10:11, :]
    o_ref[...] = bn(y2, pc, 11, 12)                            # (p, C)


def pixel_path(xf, ms_cat, hier_rest, adapt_in, packed, dims):
    b, t, h, w, c = dims
    p = b * h * w
    mf = t * p
    wc, w1, pc, p2 = packed
    kernel = functools.partial(_pixel_path_kernel, dims=dims, eps=_BN_EPS)
    return pl.pallas_call(
        kernel,
        out_shape=jax.ShapeDtypeStruct((p, c), jnp.float32),
        grid=(1,),
        in_specs=[
            pl.BlockSpec((t * b, h, w, c), lambda i: (0, 0, 0, 0)),
            pl.BlockSpec((p, 3 * c), lambda i: (0, 0)),
            pl.BlockSpec((p, 2 * c), lambda i: (0, 0)),
            pl.BlockSpec((p, c), lambda i: (0, 0)),
            pl.BlockSpec((18 * c, c), lambda i: (0, 0)),
            pl.BlockSpec((27 * c, 2 * c), lambda i: (0, 0)),
            pl.BlockSpec((13, c), lambda i: (0, 0)),
            pl.BlockSpec((3, 2 * c), lambda i: (0, 0)),
        ],
        out_specs=pl.BlockSpec((p, c), lambda i: (0, 0)),
        scratch_shapes=[
            pltpu.VMEM((t * b, h + 2, w + 2, c), _BF16),   # padded frames
            pltpu.VMEM((b, h + 2, w + 2, 3 * c), _BF16),   # padded comb image
            pltpu.VMEM((mf, 9 * c), _BF16),                # frame-conv im2col
            pltpu.VMEM((p, 27 * c), _BF16),                # final-conv im2col
            pltpu.VMEM((p, 3 * c), _BF16),                 # comb (ms|hier|adapt)
        ],
        compiler_params=pltpu.CompilerParams(
            dimension_semantics=("arbitrary",),
            vmem_limit_bytes=_VMEM_LIMIT),
    )(xf.astype(_BF16), ms_cat.astype(_BF16), hier_rest.astype(_BF16),
      adapt_in.astype(_BF16), wc, w1, pc, p2)


# ---------------------------------------------------------------------------
# Temporal glue (plain JAX; channels-last (B,T,H,W,C), T<=8 — sub-vreg sized)
# ---------------------------------------------------------------------------
def temporal_linear_interp(x, t_out):
    # F.interpolate(..., mode='trilinear', align_corners=False), H,W fixed.
    t_in = x.shape[1]
    if t_in == t_out:
        return x
    scale = t_in / t_out
    dst = jnp.arange(t_out, dtype=jnp.float32)
    src = jnp.maximum(scale * (dst + 0.5) - 0.5, 0.0)
    i0 = jnp.minimum(jnp.floor(src).astype(jnp.int32), t_in - 1)
    i1 = jnp.minimum(i0 + 1, t_in - 1)
    lam = (src - i0.astype(jnp.float32))[None, :, None, None, None]
    return x[:, i0] * (1.0 - lam) + x[:, i1] * lam


def temporal_downsample(x, scale):
    if scale == 1:
        return x
    b, t, h, w, c = x.shape
    pad = (scale - t % scale) % scale
    if pad > 0:
        x = jnp.concatenate([x, jnp.repeat(x[:, -1:], pad, axis=1)], axis=1)
        t += pad
    return x.reshape(b, t // scale, scale, h, w, c).mean(axis=2)


def attn_core(qkv, num_heads):
    # qkv: (B', T', 3*C) -> attention output (B', T', C).  Tiny; plain JAX.
    bb, tt, three_c = qkv.shape
    c = three_c // 3
    dh = c // num_heads
    qkv = qkv.reshape(bb, tt, 3, num_heads, dh)
    q = qkv[:, :, 0].transpose(0, 2, 1, 3)
    k = qkv[:, :, 1].transpose(0, 2, 1, 3)
    v = qkv[:, :, 2].transpose(0, 2, 1, 3)
    s = jnp.einsum("bhtd,bhsd->bhts", q, k) / jnp.sqrt(jnp.float32(dh))
    a = jax.nn.softmax(s, axis=-1)
    o = jnp.einsum("bhts,bhsd->bhtd", a, v)
    return o.transpose(0, 2, 1, 3).reshape(bb, tt, c)


# ---------------------------------------------------------------------------
# EnhancedTemporalFusion forward
# ---------------------------------------------------------------------------
def enhanced_temporal_fusion(x, params, num_heads=8):
    # x: (B, T, C, H, W) -> output (B, C, H, W)
    b, t, c, h, w = x.shape
    pm, ph, pa, pf = params["ms"], params["hier"], params["adapt"], params["final"]

    xc = jnp.transpose(x, (0, 1, 3, 4, 2))                  # (B,T,H,W,C) once

    # temporal variants used by the attention branches
    xd2 = temporal_downsample(xc, 2)
    xd4 = temporal_downsample(xc, 4)
    t2, t4 = xd2.shape[1], xd4.shape[1]

    seq = 4
    pad = (seq - t % seq) % seq
    xs = xc if pad == 0 else jnp.concatenate(
        [xc, jnp.repeat(xc[:, -1:], pad, axis=1)], axis=1)
    nchunk = xs.shape[1] // seq
    x_chunks = xs.reshape(b * nchunk, seq, h, w, c)

    # spatially pooled features for every attention instance + pool selector
    feat_x = jnp.mean(xc, axis=(2, 3))                      # (B,T,C)
    feat_d2 = jnp.mean(xd2, axis=(2, 3))
    feat_d4 = jnp.mean(xd4, axis=(2, 3))
    feat_ch = jnp.mean(x_chunks, axis=(2, 3))               # (B*nchunk,seq,C)
    gap = jnp.mean(feat_x, axis=1)                          # (B,C)

    # ---- merged qkv projections + selector, 128-lane aligned column groups --
    GQ = 128
    qkv_rows = [feat_x.reshape(-1, c), feat_d2.reshape(-1, c),
                feat_d4.reshape(-1, c), feat_ch.reshape(-1, c),
                feat_x.reshape(-1, c), gap]
    qkv_w = [pm["ta"][0]["wqkv"], pm["ta"][1]["wqkv"], pm["ta"][2]["wqkv"],
             ph["seq_ta"]["wqkv"], ph["snip_ta"]["wqkv"], pa["sel_w"]]
    qkv_b = [pm["ta"][0]["bqkv"], pm["ta"][1]["bqkv"], pm["ta"][2]["bqkv"],
             ph["seq_ta"]["bqkv"], ph["snip_ta"]["bqkv"], pa["sel_b"]]
    Wq = jnp.concatenate(
        [jnp.pad(wt, ((0, 0), (0, GQ - wt.shape[1]))) for wt in qkv_w], axis=1)
    bq = jnp.concatenate(
        [jnp.pad(bt_, (0, GQ - bt_.shape[0])) for bt_ in qkv_b], axis=0)
    Xq = jnp.concatenate(qkv_rows, axis=0)
    ro = [0]
    for r in qkv_rows:
        ro.append(ro[-1] + r.shape[0])
    Xq = jnp.pad(Xq, ((0, (-ro[-1]) % 8), (0, 0)))          # sublane-pad rows
    Y = matmul_bias(Xq, Wq, bq)                             # (rows, 768) f32
    widths = [3 * c] * 5 + [3]
    blk = [Y[ro[g]:ro[g + 1], g * GQ:g * GQ + widths[g]] for g in range(6)]
    qkv_ms0, qkv_ms1, qkv_ms2, qkv_seq, qkv_snip, sel_logits = blk

    o_ms0 = attn_core(qkv_ms0.reshape(b, t, 3 * c), num_heads)
    o_ms1 = attn_core(qkv_ms1.reshape(b, t2, 3 * c), num_heads)
    o_ms2 = attn_core(qkv_ms2.reshape(b, t4, 3 * c), num_heads)
    o_seq = attn_core(qkv_seq.reshape(b * nchunk, seq, 3 * c), num_heads // 2)
    o_snip = attn_core(qkv_snip.reshape(b, t, 3 * c), num_heads)

    # ---- merged output projections, N padded to 128 --------------------------
    proj_rows = [o_ms0.reshape(-1, c), o_ms1.reshape(-1, c), o_ms2.reshape(-1, c),
                 o_seq.reshape(-1, c), o_snip.reshape(-1, c)]
    proj_w = [pm["ta"][0]["wproj"], pm["ta"][1]["wproj"], pm["ta"][2]["wproj"],
              ph["seq_ta"]["wproj"], ph["snip_ta"]["wproj"]]
    proj_b = [pm["ta"][0]["bproj"], pm["ta"][1]["bproj"], pm["ta"][2]["bproj"],
              ph["seq_ta"]["bproj"], ph["snip_ta"]["bproj"]]
    n_raw = 5 * c
    n_pad = ((n_raw + 127) // 128) * 128
    Wp = jnp.pad(jnp.concatenate(proj_w, axis=1), ((0, 0), (0, n_pad - n_raw)))
    bp = jnp.pad(jnp.concatenate(proj_b, axis=0), (0, n_pad - n_raw))
    Xp = jnp.concatenate(proj_rows, axis=0)
    pro = [0]
    for r in proj_rows:
        pro.append(pro[-1] + r.shape[0])
    Xp = jnp.pad(Xp, ((0, (-pro[-1]) % 8), (0, 0)))
    Pm = matmul_bias(Xp, Wp, bp)                            # (rows, 128) f32
    p_ms0, p_ms1, p_ms2, p_seq, p_snip = [
        Pm[pro[g]:pro[g + 1], g * c:(g + 1) * c] for g in range(5)]

    # residual broadcast over H,W (assumed TemporalAttention semantics)
    att_ms0 = xc + p_ms0.reshape(b, t, 1, 1, c)
    att_ms1 = xd2 + p_ms1.reshape(b, t2, 1, 1, c)
    att_ms2 = xd4 + p_ms2.reshape(b, t4, 1, 1, c)
    att_seq = x_chunks + p_seq.reshape(b * nchunk, seq, 1, 1, c)
    att_snip = xc + p_snip.reshape(b, t, 1, 1, c)

    # ---- per-pixel inputs for the fused pixel-path kernel ---------------------
    ms_cat = jnp.concatenate(
        [jnp.mean(att_ms0, axis=1),
         jnp.mean(temporal_linear_interp(att_ms1, t), axis=1),
         jnp.mean(temporal_linear_interp(att_ms2, t), axis=1)],
        axis=-1).reshape(-1, 3 * c)                                  # (BHW,3C)

    seq_features = att_seq.mean(axis=1).reshape(b, nchunk, h, w, c).mean(axis=1)
    snip_features = att_snip.mean(axis=1)
    hier_rest = jnp.concatenate(
        [seq_features.reshape(-1, c), snip_features.reshape(-1, c)], axis=-1)

    weights_sel = jax.nn.softmax(sel_logits, axis=1)                  # (B,3)
    adaptive = jnp.zeros_like(xc)
    for i, ps in enumerate((2, 4, 8)):
        if ps <= t:
            k = t // ps                    # AdaptiveAvgPool3d((T//ps, None, None))
            pooled = xc.reshape(b, k, t // k, h, w, c).mean(axis=2)
            if k != t:
                pooled = temporal_linear_interp(pooled, t)
        else:
            pooled = xc
        adaptive = adaptive + weights_sel[:, i][:, None, None, None, None] * pooled
    adapt_in = adaptive.mean(axis=1).reshape(-1, c)                   # (BHW,C)

    # pre-compose hierarchy 1x1 convs with hierarchy final_fusion 1x1 (exact)
    final_w = ph["final_w"]
    whf = ph["hf_w"][0] @ final_w[0:c]
    whs = ph["hf_w"][1] @ final_w[c:2 * c]
    whn = ph["hf_w"][2] @ final_w[2 * c:3 * c]
    bh = (ph["hf_b"][0] @ final_w[0:c] + ph["hf_b"][1] @ final_w[c:2 * c]
          + ph["hf_b"][2] @ final_w[2 * c:3 * c] + ph["final_b"])

    wc_stack = jnp.concatenate(
        [ph["frame_conv_w"].reshape(9 * c, c),       # rows   0 :  9C
         pm["fuse_w"],                               # rows  9C : 12C
         whf,                                        # rows 12C : 13C
         jnp.concatenate([whs, whn], axis=0),        # rows 13C : 15C
         pa["fuse_w"],                               # rows 15C : 16C
         pf["conv2_w"]], axis=0).astype(_BF16)       # rows 16C : 18C
    w1 = pf["conv1_w"].reshape(27 * c, 2 * c).astype(_BF16)
    pc_stack = jnp.stack(
        [ph["frame_conv_b"], ph["frame_bn_g"], ph["frame_bn_b"],
         pm["fuse_b"], pm["bn_g"], pm["bn_b"],
         bh, ph["bn_g"], ph["bn_b"],
         pa["fuse_b"],
         pf["conv2_b"], pf["bn2_g"], pf["bn2_b"]], axis=0)            # (13,C)
    p2_stack = jnp.stack([pf["conv1_b"], pf["bn1_g"], pf["bn1_b"]], axis=0)

    xf = jnp.transpose(xc, (1, 0, 2, 3, 4)).reshape(t * b, h, w, c)   # t-major
    y = pixel_path(xf, ms_cat, hier_rest, adapt_in,
                   (wc_stack, w1, pc_stack, p2_stack), (b, t, h, w, c))
    return y.reshape(b, h, w, c).transpose(0, 3, 1, 2)                # (B,C,H,W)


# ---------------------------------------------------------------------------
# Deterministic synthetic parameters
# ---------------------------------------------------------------------------
def init_params(key, c):
    it = iter(jax.random.split(key, 64))

    def rnd(shape, scale=0.05):
        return scale * jax.random.normal(next(it), shape, dtype=jnp.float32)

    def ta():
        return dict(wqkv=rnd((c, 3 * c)), bqkv=rnd((3 * c,), 0.01),
                    wproj=rnd((c, c)), bproj=rnd((c,), 0.01))

    ones = lambda s: jnp.ones(s, jnp.float32)
    zeros = lambda s: jnp.zeros(s, jnp.float32)

    return dict(
        ms=dict(ta=[ta(), ta(), ta()],
                fuse_w=rnd((3 * c, c)), fuse_b=rnd((c,), 0.01),
                bn_g=ones((c,)), bn_b=zeros((c,))),
        hier=dict(frame_conv_w=rnd((3, 3, c, c)), frame_conv_b=rnd((c,), 0.01),
                  frame_bn_g=ones((c,)), frame_bn_b=zeros((c,)),
                  seq_ta=ta(), snip_ta=ta(),
                  hf_w=[rnd((c, c)) for _ in range(3)],
                  hf_b=[rnd((c,), 0.01) for _ in range(3)],
                  final_w=rnd((3 * c, c)), final_b=rnd((c,), 0.01),
                  bn_g=ones((c,)), bn_b=zeros((c,))),
        adapt=dict(sel_w=rnd((c, 3)), sel_b=rnd((3,), 0.01),
                   fuse_w=rnd((c, c)), fuse_b=rnd((c,), 0.01)),
        final=dict(conv1_w=rnd((3, 3, 3 * c, 2 * c)), conv1_b=rnd((2 * c,), 0.01),
                   bn1_g=ones((2 * c,)), bn1_b=zeros((2 * c,)),
                   conv2_w=rnd((2 * c, c)), conv2_b=rnd((c,), 0.01),
                   bn2_g=ones((c,)), bn2_b=zeros((c,))),
    )


if __name__ == "__main__":
    B, T, C, H, W = 2, 8, 16, 8, 8   # feature_dim=16, num_frames=8, heads=8
    key = jax.random.PRNGKey(0)
    kx, kp = jax.random.split(key)
    x = jax.random.normal(kx, (B, T, C, H, W), dtype=jnp.float32)
    params = init_params(kp, C)

    fwd = jax.jit(enhanced_temporal_fusion)
    out = fwd(x, params)
    jax.block_until_ready(out)
    assert out.shape == (B, C, H, W), out.shape
    assert bool(jnp.all(jnp.isfinite(out)))
    print("KERNEL_OK")
</pallas_src>

<mosaic_0001>
module attributes {stable_mosaic.version = 11 : i64} {
  func.func @_mm_bias_kernel(%arg0: i32, %arg1: memref<64x16xbf16, #tpu.memory_space<vmem>>, %arg2: memref<16x768xbf16, #tpu.memory_space<vmem>>, %arg3: memref<1x768xf32, #tpu.memory_space<vmem>>, %arg4: memref<64x768xf32, #tpu.memory_space<vmem>>) attributes {dimension_semantics = [#tpu.dimension_semantics<arbitrary>], iteration_bounds = array<i64: 1>, scalar_prefetch = 0 : i64, scratch_operands = 0 : i64, tpu.core_type = #tpu.core_type<tc>, window_params = [{pipeline_mode = #tpu.pipeline_mode<synchronous>, transform_indices = @transform_0, window_bounds = array<i64: 64, 16>}, {pipeline_mode = #tpu.pipeline_mode<synchronous>, transform_indices = @transform_1, window_bounds = array<i64: 16, 768>}, {pipeline_mode = #tpu.pipeline_mode<synchronous>, transform_indices = @transform_2, window_bounds = array<i64: 1, 768>}, {pipeline_mode = #tpu.pipeline_mode<synchronous>, transform_indices = @transform_3, window_bounds = array<i64: 64, 768>}]} {
    %c0 = arith.constant 0 : index
    %c0_0 = arith.constant 0 : index
    %0 = vector.load %arg1[%c0, %c0_0] : memref<64x16xbf16, #tpu.memory_space<vmem>>, vector<64x16xbf16>
    %c0_1 = arith.constant 0 : index
    %c0_2 = arith.constant 0 : index
    %1 = vector.load %arg2[%c0_1, %c0_2] : memref<16x768xbf16, #tpu.memory_space<vmem>>, vector<16x768xbf16>
    %cst = arith.constant dense<0.000000e+00> : vector<64x768xf32>
    %2 = tpu.matmul %0, %1, %cst {dimension_numbers = #tpu.dot_dimension_numbers<[1], [0], [0], [1], [0, 0, 1, 1], [], []>} : vector<64x16xbf16>, vector<16x768xbf16>, vector<64x768xf32> -> vector<64x768xf32>
    %c0_3 = arith.constant 0 : index
    %c0_4 = arith.constant 0 : index
    %3 = vector.load %arg3[%c0_3, %c0_4] : memref<1x768xf32, #tpu.memory_space<vmem>>, vector<1x768xf32>
    %4 = vector.broadcast %3 : vector<1x768xf32> to vector<64x768xf32>
    %5 = arith.addf %2, %4 : vector<64x768xf32>
    %c0_5 = arith.constant 0 : index
    %c0_6 = arith.constant 0 : index
    %6 = vector.load %arg4[%c0_5, %c0_6] : memref<64x768xf32, #tpu.memory_space<vmem>>, vector<64x768xf32>
    tpu.vector_store %arg4[%c0_5, %c0_6], %5 {strides = array<i32>} : memref<64x768xf32, #tpu.memory_space<vmem>>, vector<64x768xf32>,
    return
  }
  func.func @transform_0(%arg0: i32) -> (i32, i32) {
    %c0_i32 = arith.constant 0 : i32
    %c0_i32_0 = arith.constant 0 : i32
    %c0_i32_1 = arith.constant 0 : i32
    return %c0_i32, %c0_i32_0 : i32, i32
  }
  func.func @transform_1(%arg0: i32) -> (i32, i32) {
    %c0_i32 = arith.constant 0 : i32
    %c0_i32_0 = arith.constant 0 : i32
    %c0_i32_1 = arith.constant 0 : i32
    return %c0_i32, %c0_i32_0 : i32, i32
  }
  func.func @transform_2(%arg0: i32) -> (i32, i32) {
    %c0_i32 = arith.constant 0 : i32
    %c0_i32_0 = arith.constant 0 : i32
    %c0_i32_1 = arith.constant 0 : i32
    return %c0_i32, %c0_i32_0 : i32, i32
  }
  func.func @transform_3(%arg0: i32) -> (i32, i32) {
    %c0_i32 = arith.constant 0 : i32
    %c0_i32_0 = arith.constant 0 : i32
    %c0_i32_1 = arith.constant 0 : i32
    return %c0_i32, %c0_i32_0 : i32, i32
  }
}

module attributes {stable_mosaic.version = 11 : i64} {
  func.func @_mm_bias_kernel(%arg0: i32, %arg1: memref<64x16xbf16, #tpu.memory_space<vmem>>, %arg2: memref<16x128xbf16, #tpu.memory_space<vmem>>, %arg3: memref<1x128xf32, #tpu.memory_space<vmem>>, %arg4: memref<64x128xf32, #tpu.memory_space<vmem>>) attributes {dimension_semantics = [#tpu.dimension_semantics<arbitrary>], iteration_bounds = array<i64: 1>, scalar_prefetch = 0 : i64, scratch_operands = 0 : i64, tpu.core_type = #tpu.core_type<tc>, window_params = [{pipeline_mode = #tpu.pipeline_mode<synchronous>, transform_indices = @transform_0, window_bounds = array<i64: 64, 16>}, {pipeline_mode = #tpu.pipeline_mode<synchronous>, transform_indices = @transform_1, window_bounds = array<i64: 16, 128>}, {pipeline_mode = #tpu.pipeline_mode<synchronous>, transform_indices = @transform_2, window_bounds = array<i64: 1, 128>}, {pipeline_mode = #tpu.pipeline_mode<synchronous>, transform_indices = @transform_3, window_bounds = array<i64: 64, 128>}]} {
    %c0 = arith.constant 0 : index
    %c0_0 = arith.constant 0 : index
    %0 = vector.load %arg1[%c0, %c0_0] : memref<64x16xbf16, #tpu.memory_space<vmem>>, vector<64x16xbf16>
    %c0_1 = arith.constant 0 : index
    %c0_2 = arith.constant 0 : index
    %1 = vector.load %arg2[%c0_1, %c0_2] : memref<16x128xbf16, #tpu.memory_space<vmem>>, vector<16x128xbf16>
    %cst = arith.constant dense<0.000000e+00> : vector<64x128xf32>
    %2 = tpu.matmul %0, %1, %cst {dimension_numbers = #tpu.dot_dimension_numbers<[1], [0], [0], [1], [0, 0, 1, 1], [], []>} : vector<64x16xbf16>, vector<16x128xbf16>, vector<64x128xf32> -> vector<64x128xf32>
    %c0_3 = arith.constant 0 : index
    %c0_4 = arith.constant 0 : index
    %3 = vector.load %arg3[%c0_3, %c0_4] : memref<1x128xf32, #tpu.memory_space<vmem>>, vector<1x128xf32>
    %4 = vector.broadcast %3 : vector<1x128xf32> to vector<64x128xf32>
    %5 = arith.addf %2, %4 : vector<64x128xf32>
    %c0_5 = arith.constant 0 : index
    %c0_6 = arith.constant 0 : index
    %6 = vector.load %arg4[%c0_5, %c0_6] : memref<64x128xf32, #tpu.memory_space<vmem>>, vector<64x128xf32>
    tpu.vector_store %arg4[%c0_5, %c0_6], %5 {strides = array<i32>} : memref<64x128xf32, #tpu.memory_space<vmem>>, vector<64x128xf32>,
    return
  }
  func.func @transform_0(%arg0: i32) -> (i32, i32) {
    %c0_i32 = arith.constant 0 : i32
    %c0_i32_0 = arith.constant 0 : i32
    %c0_i32_1 = arith.constant 0 : i32
    return %c0_i32, %c0_i32_0 : i32, i32
  }
  func.func @transform_1(%arg0: i32) -> (i32, i32) {
    %c0_i32 = arith.constant 0 : i32
    %c0_i32_0 = arith.constant 0 : i32
    %c0_i32_1 = arith.constant 0 : i32
    return %c0_i32, %c0_i32_0 : i32, i32
  }
  func.func @transform_2(%arg0: i32) -> (i32, i32) {
    %c0_i32 = arith.constant 0 : i32
    %c0_i32_0 = arith.constant 0 : i32
    %c0_i32_1 = arith.constant 0 : i32
    return %c0_i32, %c0_i32_0 : i32, i32
  }
  func.func @transform_3(%arg0: i32) -> (i32, i32) {
    %c0_i32 = arith.constant 0 : i32
    %c0_i32_0 = arith.constant 0 : i32
    %c0_i32_1 = arith.constant 0 : i32
    return %c0_i32, %c0_i32_0 : i32, i32
  }
}

module attributes {stable_mosaic.version = 11 : i64} {
  func.func @_pixel_path_kernel(%arg0: i32, %arg1: memref<16x8x8x16xbf16, #tpu.memory_space<vmem>>, %arg2: memref<128x48xbf16, #tpu.memory_space<vmem>>, %arg3: memref<128x32xbf16, #tpu.memory_space<vmem>>, %arg4: memref<128x16xbf16, #tpu.memory_space<vmem>>, %arg5: memref<288x16xbf16, #tpu.memory_space<vmem>>, %arg6: memref<432x32xbf16, #tpu.memory_space<vmem>>, %arg7: memref<13x16xf32, #tpu.memory_space<vmem>>, %arg8: memref<3x32xf32, #tpu.memory_space<vmem>>, %arg9: memref<128x16xf32, #tpu.memory_space<vmem>>, %arg10: memref<16x10x10x16xbf16, #tpu.memory_space<vmem>>, %arg11: memref<2x10x10x48xbf16, #tpu.memory_space<vmem>>, %arg12: memref<1024x144xbf16, #tpu.memory_space<vmem>>, %arg13: memref<128x432xbf16, #tpu.memory_space<vmem>>, %arg14: memref<128x48xbf16, #tpu.memory_space<vmem>>) attributes {dimension_semantics = [#tpu.dimension_semantics<arbitrary>], iteration_bounds = array<i64: 1>, scalar_prefetch = 0 : i64, scratch_operands = 5 : i64, tpu.core_type = #tpu.core_type<tc>, window_params = [{pipeline_mode = #tpu.pipeline_mode<synchronous>, transform_indices = @transform_0, window_bounds = array<i64: 16, 8, 8, 16>}, {pipeline_mode = #tpu.pipeline_mode<synchronous>, transform_indices = @transform_1, window_bounds = array<i64: 128, 48>}, {pipeline_mode = #tpu.pipeline_mode<synchronous>, transform_indices = @transform_2, window_bounds = array<i64: 128, 32>}, {pipeline_mode = #tpu.pipeline_mode<synchronous>, transform_indices = @transform_3, window_bounds = array<i64: 128, 16>}, {pipeline_mode = #tpu.pipeline_mode<synchronous>, transform_indices = @transform_4, window_bounds = array<i64: 288, 16>}, {pipeline_mode = #tpu.pipeline_mode<synchronous>, transform_indices = @transform_5, window_bounds = array<i64: 432, 32>}, {pipeline_mode = #tpu.pipeline_mode<synchronous>, transform_indices = @transform_6, window_bounds = array<i64: 13, 16>}, {pipeline_mode = #tpu.pipeline_mode<synchronous>, transform_indices = @transform_7, window_bounds = array<i64: 3, 32>}, {pipeline_mode = #tpu.pipeline_mode<synchronous>, transform_indices = @transform_8, window_bounds = array<i64: 128, 16>}]} {
    %c0 = arith.constant 0 : index
    %c0_0 = arith.constant 0 : index
    %0 = vector.load %arg7[%c0, %c0_0] : memref<13x16xf32, #tpu.memory_space<vmem>>, vector<13x16xf32>
    %c0_1 = arith.constant 0 : index
    %c0_2 = arith.constant 0 : index
    %1 = vector.load %arg8[%c0_1, %c0_2] : memref<3x32xf32, #tpu.memory_space<vmem>>, vector<3x32xf32>
    %cst = arith.constant 0.000000e+00 : bf16
    %2 = vector.broadcast %cst : bf16 to vector<16x10x10x16xbf16>
    %c0_3 = arith.constant 0 : index
    %c0_4 = arith.constant 0 : index
    %c0_5 = arith.constant 0 : index
    %c0_6 = arith.constant 0 : index
    %3 = vector.load %arg10[%c0_3, %c0_4, %c0_5, %c0_6] : memref<16x10x10x16xbf16, #tpu.memory_space<vmem>>, vector<16x10x10x16xbf16>
    tpu.vector_store %arg10[%c0_3, %c0_4, %c0_5, %c0_6], %2 {strides = array<i32>} : memref<16x10x10x16xbf16, #tpu.memory_space<vmem>>, vector<16x10x10x16xbf16>,
    %c0_7 = arith.constant 0 : index
    %c0_8 = arith.constant 0 : index
    %c0_9 = arith.constant 0 : index
    %c0_10 = arith.constant 0 : index
    %4 = vector.load %arg1[%c0_7, %c0_8, %c0_9, %c0_10] : memref<16x8x8x16xbf16, #tpu.memory_space<vmem>>, vector<16x8x8x16xbf16>
    %c0_11 = arith.constant 0 : index
    %c1 = arith.constant 1 : index
    %c1_12 = arith.constant 1 : index
    %c0_13 = arith.constant 0 : index
    %5 = vector.load %arg10[%c0_11, %c1, %c1_12, %c0_13] : memref<16x10x10x16xbf16, #tpu.memory_space<vmem>>, vector<16x8x8x16xbf16>
    tpu.vector_store %arg10[%c0_11, %c1, %c1_12, %c0_13], %4 {strides = array<i32>} : memref<16x10x10x16xbf16, #tpu.memory_space<vmem>>, vector<16x8x8x16xbf16>,
    %c0_14 = arith.constant 0 : index
    %c0_15 = arith.constant 0 : index
    %c0_16 = arith.constant 0 : index
    %c0_17 = arith.constant 0 : index
    %6 = vector.load %arg10[%c0_14, %c0_15, %c0_16, %c0_17] : memref<16x10x10x16xbf16, #tpu.memory_space<vmem>>, vector<16x8x8x16xbf16>
    %7 = vector.shape_cast %6 : vector<16x8x8x16xbf16> to vector<1024x16xbf16>
    %c0_18 = arith.constant 0 : index
    %c0_19 = arith.constant 0 : index
    %8 = vector.load %arg12[%c0_18, %c0_19] : memref<1024x144xbf16, #tpu.memory_space<vmem>>, vector<1024x16xbf16>
    tpu.vector_store %arg12[%c0_18, %c0_19], %7 {strides = array<i32>} : memref<1024x144xbf16, #tpu.memory_space<vmem>>, vector<1024x16xbf16>,
    %c0_20 = arith.constant 0 : index
    %c0_21 = arith.constant 0 : index
    %c1_22 = arith.constant 1 : index
    %c0_23 = arith.constant 0 : index
    %9 = vector.load %arg10[%c0_20, %c0_21, %c1_22, %c0_23] : memref<16x10x10x16xbf16, #tpu.memory_space<vmem>>, vector<16x8x8x16xbf16>
    %10 = vector.shape_cast %9 : vector<16x8x8x16xbf16> to vector<1024x16xbf16>
    %c0_24 = arith.constant 0 : index
    %c16 = arith.constant 16 : index
    %11 = vector.load %arg12[%c0_24, %c16] : memref<1024x144xbf16, #tpu.memory_space<vmem>>, vector<1024x16xbf16>
    tpu.vector_store %arg12[%c0_24, %c16], %10 {strides = array<i32>} : memref<1024x144xbf16, #tpu.memory_space<vmem>>, vector<1024x16xbf16>,
    %c0_25 = arith.constant 0 : index
    %c0_26 = arith.constant 0 : index
    %c2 = arith.constant 2 : index
    %c0_27 = arith.constant 0 : index
    %12 = vector.load %arg10[%c0_25, %c0_26, %c2, %c0_27] : memref<16x10x10x16xbf16, #tpu.memory_space<vmem>>, vector<16x8x8x16xbf16>
    %13 = vector.shape_cast %12 : vector<16x8x8x16xbf16> to vector<1024x16xbf16>
    %c0_28 = arith.constant 0 : index
    %c32 = arith.constant 32 : index
    %14 = vector.load %arg12[%c0_28, %c32] : memref<1024x144xbf16, #tpu.memory_space<vmem>>, vector<1024x16xbf16>
    tpu.vector_store %arg12[%c0_28, %c32], %13 {strides = array<i32>} : memref<1024x144xbf16, #tpu.memory_space<vmem>>, vector<1024x16xbf16>,
    %c0_29 = arith.constant 0 : index
    %c1_30 = arith.constant 1 : index
    %c0_31 = arith.constant 0 : index
    %c0_32 = arith.constant 0 : index
    %15 = vector.load %arg10[%c0_29, %c1_30, %c0_31, %c0_32] : memref<16x10x10x16xbf16, #tpu.memory_space<vmem>>, vector<16x8x8x16xbf16>
    %16 = vector.shape_cast %15 : vector<16x8x8x16xbf16> to vector<1024x16xbf16>
    %c0_33 = arith.constant 0 : index
    %c48 = arith.constant 48 : index
    %17 = vector.load %arg12[%c0_33, %c48] : memref<1024x144xbf16, #tpu.memory_space<vmem>>, vector<1024x16xbf16>
    tpu.vector_store %arg12[%c0_33, %c48], %16 {strides = array<i32>} : memref<1024x144xbf16, #tpu.memory_space<vmem>>, vector<1024x16xbf16>,
    %c0_34 = arith.constant 0 : index
    %c1_35 = arith.constant 1 : index
    %c1_36 = arith.constant 1 : index
    %c0_37 = arith.constant 0 : index
    %18 = vector.load %arg10[%c0_34, %c1_35, %c1_36, %c0_37] : memref<16x10x10x16xbf16, #tpu.memory_space<vmem>>, vector<16x8x8x16xbf16>
    %19 = vector.shape_cast %18 : vector<16x8x8x16xbf16> to vector<1024x16xbf16>
    %c0_38 = arith.constant 0 : index
    %c64 = arith.constant 64 : index
    %20 = vector.load %arg12[%c0_38, %c64] : memref<1024x144xbf16, #tpu.memory_space<vmem>>, vector<1024x16xbf16>
    tpu.vector_store %arg12[%c0_38, %c64], %19 {strides = array<i32>} : memref<1024x144xbf16, #tpu.memory_space<vmem>>, vector<1024x16xbf16>,
    %c0_39 = arith.constant 0 : index
    %c1_40 = arith.constant 1 : index
    %c2_41 = arith.constant 2 : index
    %c0_42 = arith.constant 0 : index
    %21 = vector.load %arg10[%c0_39, %c1_40, %c2_41, %c0_42] : memref<16x10x10x16xbf16, #tpu.memory_space<vmem>>, vector<16x8x8x16xbf16>
    %22 = vector.shape_cast %21 : vector<16x8x8x16xbf16> to vector<1024x16xbf16>
    %c0_43 = arith.constant 0 : index
    %c80 = arith.constant 80 : index
    %23 = vector.load %arg12[%c0_43, %c80] : memref<1024x144xbf16, #tpu.memory_space<vmem>>, vector<1024x16xbf16>
    tpu.vector_store %arg12[%c0_43, %c80], %22 {strides = array<i32>} : memref<1024x144xbf16, #tpu.memory_space<vmem>>, vector<1024x16xbf16>,
    %c0_44 = arith.constant 0 : index
    %c2_45 = arith.constant 2 : index
    %c0_46 = arith.constant 0 : index
    %c0_47 = arith.constant 0 : index
    %24 = vector.load %arg10[%c0_44, %c2_45, %c0_46, %c0_47] : memref<16x10x10x16xbf16, #tpu.memory_space<vmem>>, vector<16x8x8x16xbf16>
    %25 = vector.shape_cast %24 : vector<16x8x8x16xbf16> to vector<1024x16xbf16>
    %c0_48 = arith.constant 0 : index
    %c96 = arith.constant 96 : index
    %26 = vector.load %arg12[%c0_48, %c96] : memref<1024x144xbf16, #tpu.memory_space<vmem>>, vector<1024x16xbf16>
    tpu.vector_store %arg12[%c0_48, %c96], %25 {strides = array<i32>} : memref<1024x144xbf16, #tpu.memory_space<vmem>>, vector<1024x16xbf16>,
    %c0_49 = arith.constant 0 : index
    %c2_50 = arith.constant 2 : index
    %c1_51 = arith.constant 1 : index
    %c0_52 = arith.constant 0 : index
    %27 = vector.load %arg10[%c0_49, %c2_50, %c1_51, %c0_52] : memref<16x10x10x16xbf16, #tpu.memory_space<vmem>>, vector<16x8x8x16xbf16>
    %28 = vector.shape_cast %27 : vector<16x8x8x16xbf16> to vector<1024x16xbf16>
    %c0_53 = arith.constant 0 : index
    %c112 = arith.constant 112 : index
    %29 = vector.load %arg12[%c0_53, %c112] : memref<1024x144xbf16, #tpu.memory_space<vmem>>, vector<1024x16xbf16>
    tpu.vector_store %arg12[%c0_53, %c112], %28 {strides = array<i32>} : memref<1024x144xbf16, #tpu.memory_space<vmem>>, vector<1024x16xbf16>,
    %c0_54 = arith.constant 0 : index
    %c2_55 = arith.constant 2 : index
    %c2_56 = arith.constant 2 : index
    %c0_57 = arith.constant 0 : index
    %30 = vector.load %arg10[%c0_54, %c2_55, %c2_56, %c0_57] : memref<16x10x10x16xbf16, #tpu.memory_space<vmem>>, vector<16x8x8x16xbf16>
    %31 = vector.shape_cast %30 : vector<16x8x8x16xbf16> to vector<1024x16xbf16>
    %c0_58 = arith.constant 0 : index
    %c128 = arith.constant 128 : index
    %32 = vector.load %arg12[%c0_58, %c128] : memref<1024x144xbf16, #tpu.memory_space<vmem>>, vector<1024x16xbf16>
    tpu.vector_store %arg12[%c0_58, %c128], %31 {strides = array<i32>} : memref<1024x144xbf16, #tpu.memory_space<vmem>>, vector<1024x16xbf16>,
    %c0_59 = arith.constant 0 : index
    %c0_60 = arith.constant 0 : index
    %33 = vector.load %arg12[%c0_59, %c0_60] : memref<1024x144xbf16, #tpu.memory_space<vmem>>, vector<1024x144xbf16>
    %c0_61 = arith.constant 0 : index
    %c0_62 = arith.constant 0 : index
    %34 = vector.load %arg5[%c0_61, %c0_62] : memref<288x16xbf16, #tpu.memory_space<vmem>>, vector<144x16xbf16>
    %cst_63 = arith.constant dense<0.000000e+00> : vector<1024x16xf32>
    %35 = tpu.matmul %33, %34, %cst_63 {dimension_numbers = #tpu.dot_dimension_numbers<[1], [0], [0], [1], [0, 0, 1, 1], [], []>} : vector<1024x144xbf16>, vector<144x16xbf16>, vector<1024x16xf32> -> vector<1024x16xf32>
    %36 = vector.extract_strided_slice %0 {offsets = [0, 0], sizes = [1, 16], strides = [1, 1]} : vector<13x16xf32> to vector<1x16xf32>
    %37 = vector.broadcast %36 : vector<1x16xf32> to vector<1024x16xf32>
    %38 = arith.addf %35, %37 : vector<1024x16xf32>
    %cst_64 = arith.constant dense<0.000000e+00> : vector<16xf32>
    %39 = vector.multi_reduction <add>, %38, %cst_64 [0] : vector<1024x16xf32> to vector<16xf32>
    %40 = vector.shape_cast %39 : vector<16xf32> to vector<1x16xf32>
    %cst_65 = arith.constant 1.024000e+03 : f32
    %41 = vector.broadcast %cst_65 : f32 to vector<1x16xf32>
    %42 = arith.divf %40, %41 : vector<1x16xf32>
    %43 = vector.broadcast %42 : vector<1x16xf32> to vector<1024x16xf32>
    %44 = arith.subf %38, %43 : vector<1024x16xf32>
    %45 = arith.mulf %44, %44 : vector<1024x16xf32>
    %cst_66 = arith.constant dense<0.000000e+00> : vector<16xf32>
    %46 = vector.multi_reduction <add>, %45, %cst_66 [0] : vector<1024x16xf32> to vector<16xf32>
    %47 = vector.shape_cast %46 : vector<16xf32> to vector<1x16xf32>
    %cst_67 = arith.constant 1.024000e+03 : f32
    %48 = vector.broadcast %cst_67 : f32 to vector<1x16xf32>
    %49 = arith.divf %47, %48 : vector<1x16xf32>
    %50 = vector.broadcast %42 : vector<1x16xf32> to vector<1024x16xf32>
    %51 = arith.subf %38, %50 : vector<1024x16xf32>
    %52 = vector.extract_strided_slice %0 {offsets = [1, 0], sizes = [1, 16], strides = [1, 1]} : vector<13x16xf32> to vector<1x16xf32>
    %cst_68 = arith.constant 9.99999974E-6 : f32
    %53 = vector.broadcast %cst_68 : f32 to vector<1x16xf32>
    %54 = arith.addf %49, %53 : vector<1x16xf32>
    %55 = math.rsqrt %54 : vector<1x16xf32>
    %56 = arith.mulf %52, %55 : vector<1x16xf32>
    %57 = vector.broadcast %56 : vector<1x16xf32> to vector<1024x16xf32>
    %58 = arith.mulf %51, %57 : vector<1024x16xf32>
    %59 = vector.extract_strided_slice %0 {offsets = [2, 0], sizes = [1, 16], strides = [1, 1]} : vector<13x16xf32> to vector<1x16xf32>
    %60 = vector.broadcast %59 : vector<1x16xf32> to vector<1024x16xf32>
    %61 = arith.addf %58, %60 : vector<1024x16xf32>
    %cst_69 = arith.constant 0.000000e+00 : f32
    %62 = vector.broadcast %cst_69 : f32 to vector<1024x16xf32>
    %63 = arith.maximumf %61, %62 : vector<1024x16xf32>
    %64 = vector.extract_strided_slice %63 {offsets = [0, 0], sizes = [128, 16], strides = [1, 1]} : vector<1024x16xf32> to vector<128x16xf32>
    %65 = vector.extract_strided_slice %63 {offsets = [128, 0], sizes = [128, 16], strides = [1, 1]} : vector<1024x16xf32> to vector<128x16xf32>
    %66 = arith.addf %64, %65 : vector<128x16xf32>
    %67 = vector.extract_strided_slice %63 {offsets = [256, 0], sizes = [128, 16], strides = [1, 1]} : vector<1024x16xf32> to vector<128x16xf32>
    %68 = arith.addf %66, %67 : vector<128x16xf32>
    %69 = vector.extract_strided_slice %63 {offsets = [384, 0], sizes = [128, 16], strides = [1, 1]} : vector<1024x16xf32> to vector<128x16xf32>
    %70 = arith.addf %68, %69 : vector<128x16xf32>
    %71 = vector.extract_strided_slice %63 {offsets = [512, 0], sizes = [128, 16], strides = [1, 1]} : vector<1024x16xf32> to vector<128x16xf32>
    %72 = arith.addf %70, %71 : vector<128x16xf32>
    %73 = vector.extract_strided_slice %63 {offsets = [640, 0], sizes = [128, 16], strides = [1, 1]} : vector<1024x16xf32> to vector<128x16xf32>
    %74 = arith.addf %72, %73 : vector<128x16xf32>
    %75 = vector.extract_strided_slice %63 {offsets = [768, 0], sizes = [128, 16], strides = [1, 1]} : vector<1024x16xf32> to vector<128x16xf32>
    %76 = arith.addf %74, %75 : vector<128x16xf32>
    %77 = vector.extract_strided_slice %63 {offsets = [896, 0], sizes = [128, 16], strides = [1, 1]} : vector<1024x16xf32> to vector<128x16xf32>
    %78 = arith.addf %76, %77 : vector<128x16xf32>
    %cst_70 = arith.constant 1.250000e-01 : f32
    %79 = vector.broadcast %cst_70 : f32 to vector<128x16xf32>
    %80 = arith.mulf %78, %79 : vector<128x16xf32>
    %c0_71 = arith.constant 0 : index
    %c0_72 = arith.constant 0 : index
    %81 = vector.load %arg2[%c0_71, %c0_72] : memref<128x48xbf16, #tpu.memory_space<vmem>>, vector<128x48xbf16>
    %c144 = arith.constant 144 : index
    %c0_73 = arith.constant 0 : index
    %82 = vector.load %arg5[%c144, %c0_73] : memref<288x16xbf16, #tpu.memory_space<vmem>>, vector<48x16xbf16>
    %cst_74 = arith.constant dense<0.000000e+00> : vector<128x16xf32>
    %83 = tpu.matmul %81, %82, %cst_74 {dimension_numbers = #tpu.dot_dimension_numbers<[1], [0], [0], [1], [0, 0, 1, 1], [], []>} : vector<128x48xbf16>, vector<48x16xbf16>, vector<128x16xf32> -> vector<128x16xf32>
    %84 = vector.extract_strided_slice %0 {offsets = [3, 0], sizes = [1, 16], strides = [1, 1]} : vector<13x16xf32> to vector<1x16xf32>
    %85 = vector.broadcast %84 : vector<1x16xf32> to vector<128x16xf32>
    %86 = arith.addf %83, %85 : vector<128x16xf32>
    %cst_75 = arith.constant dense<0.000000e+00> : vector<16xf32>
    %87 = vector.multi_reduction <add>, %86, %cst_75 [0] : vector<128x16xf32> to vector<16xf32>
    %88 = vector.shape_cast %87 : vector<16xf32> to vector<1x16xf32>
    %cst_76 = arith.constant 1.280000e+02 : f32
    %89 = vector.broadcast %cst_76 : f32 to vector<1x16xf32>
    %90 = arith.divf %88, %89 : vector<1x16xf32>
    %91 = vector.broadcast %90 : vector<1x16xf32> to vector<128x16xf32>
    %92 = arith.subf %86, %91 : vector<128x16xf32>
    %93 = arith.mulf %92, %92 : vector<128x16xf32>
    %cst_77 = arith.constant dense<0.000000e+00> : vector<16xf32>
    %94 = vector.multi_reduction <add>, %93, %cst_77 [0] : vector<128x16xf32> to vector<16xf32>
    %95 = vector.shape_cast %94 : vector<16xf32> to vector<1x16xf32>
    %cst_78 = arith.constant 1.280000e+02 : f32
    %96 = vector.broadcast %cst_78 : f32 to vector<1x16xf32>
    %97 = arith.divf %95, %96 : vector<1x16xf32>
    %98 = vector.broadcast %90 : vector<1x16xf32> to vector<128x16xf32>
    %99 = arith.subf %86, %98 : vector<128x16xf32>
    %100 = vector.extract_strided_slice %0 {offsets = [4, 0], sizes = [1, 16], strides = [1, 1]} : vector<13x16xf32> to vector<1x16xf32>
    %cst_79 = arith.constant 9.99999974E-6 : f32
    %101 = vector.broadcast %cst_79 : f32 to vector<1x16xf32>
    %102 = arith.addf %97, %101 : vector<1x16xf32>
    %103 = math.rsqrt %102 : vector<1x16xf32>
    %104 = arith.mulf %100, %103 : vector<1x16xf32>
    %105 = vector.broadcast %104 : vector<1x16xf32> to vector<128x16xf32>
    %106 = arith.mulf %99, %105 : vector<128x16xf32>
    %107 = vector.extract_strided_slice %0 {offsets = [5, 0], sizes = [1, 16], strides = [1, 1]} : vector<13x16xf32> to vector<1x16xf32>
    %108 = vector.broadcast %107 : vector<1x16xf32> to vector<128x16xf32>
    %109 = arith.addf %106, %108 : vector<128x16xf32>
    %110 = arith.truncf %80 : vector<128x16xf32> to vector<128x16xbf16>
    %c192 = arith.constant 192 : index
    %c0_80 = arith.constant 0 : index
    %111 = vector.load %arg5[%c192, %c0_80] : memref<288x16xbf16, #tpu.memory_space<vmem>>, vector<16x16xbf16>
    %cst_81 = arith.constant dense<0.000000e+00> : vector<128x16xf32>
    %112 = tpu.matmul %110, %111, %cst_81 {dimension_numbers = #tpu.dot_dimension_numbers<[1], [0], [0], [1], [0, 0, 1, 1], [], []>} : vector<128x16xbf16>, vector<16x16xbf16>, vector<128x16xf32> -> vector<128x16xf32>
    %c0_82 = arith.constant 0 : index
    %c0_83 = arith.constant 0 : index
    %113 = vector.load %arg3[%c0_82, %c0_83] : memref<128x32xbf16, #tpu.memory_space<vmem>>, vector<128x32xbf16>
    %c208 = arith.constant 208 : index
    %c0_84 = arith.constant 0 : index
    %114 = vector.load %arg5[%c208, %c0_84] : memref<288x16xbf16, #tpu.memory_space<vmem>>, vector<32x16xbf16>
    %cst_85 = arith.constant dense<0.000000e+00> : vector<128x16xf32>
    %115 = tpu.matmul %113, %114, %cst_85 {dimension_numbers = #tpu.dot_dimension_numbers<[1], [0], [0], [1], [0, 0, 1, 1], [], []>} : vector<128x32xbf16>, vector<32x16xbf16>, vector<128x16xf32> -> vector<128x16xf32>
    %116 = arith.addf %112, %115 : vector<128x16xf32>
    %117 = vector.extract_strided_slice %0 {offsets = [6, 0], sizes = [1, 16], strides = [1, 1]} : vector<13x16xf32> to vector<1x16xf32>
    %118 = vector.broadcast %117 : vector<1x16xf32> to vector<128x16xf32>
    %119 = arith.addf %116, %118 : vector<128x16xf32>
    %cst_86 = arith.constant dense<0.000000e+00> : vector<16xf32>
    %120 = vector.multi_reduction <add>, %119, %cst_86 [0] : vector<128x16xf32> to vector<16xf32>
    %121 = vector.shape_cast %120 : vector<16xf32> to vector<1x16xf32>
    %cst_87 = arith.constant 1.280000e+02 : f32
    %122 = vector.broadcast %cst_87 : f32 to vector<1x16xf32>
    %123 = arith.divf %121, %122 : vector<1x16xf32>
    %124 = vector.broadcast %123 : vector<1x16xf32> to vector<128x16xf32>
    %125 = arith.subf %119, %124 : vector<128x16xf32>
    %126 = arith.mulf %125, %125 : vector<128x16xf32>
    %cst_88 = arith.constant dense<0.000000e+00> : vector<16xf32>
    %127 = vector.multi_reduction <add>, %126, %cst_88 [0] : vector<128x16xf32> to vector<16xf32>
    %128 = vector.shape_cast %127 : vector<16xf32> to vector<1x16xf32>
    %cst_89 = arith.constant 1.280000e+02 : f32
    %129 = vector.broadcast %cst_89 : f32 to vector<1x16xf32>
    %130 = arith.divf %128, %129 : vector<1x16xf32>
    %131 = vector.broadcast %123 : vector<1x16xf32> to vector<128x16xf32>
    %132 = arith.subf %119, %131 : vector<128x16xf32>
    %133 = vector.extract_strided_slice %0 {offsets = [7, 0], sizes = [1, 16], strides = [1, 1]} : vector<13x16xf32> to vector<1x16xf32>
    %cst_90 = arith.constant 9.99999974E-6 : f32
    %134 = vector.broadcast %cst_90 : f32 to vector<1x16xf32>
    %135 = arith.addf %130, %134 : vector<1x16xf32>
    %136 = math.rsqrt %135 : vector<1x16xf32>
    %137 = arith.mulf %133, %136 : vector<1x16xf32>
    %138 = vector.broadcast %137 : vector<1x16xf32> to vector<128x16xf32>
    %139 = arith.mulf %132, %138 : vector<128x16xf32>
    %140 = vector.extract_strided_slice %0 {offsets = [8, 0], sizes = [1, 16], strides = [1, 1]} : vector<13x16xf32> to vector<1x16xf32>
    %141 = vector.broadcast %140 : vector<1x16xf32> to vector<128x16xf32>
    %142 = arith.addf %139, %141 : vector<128x16xf32>
    %c0_91 = arith.constant 0 : index
    %c0_92 = arith.constant 0 : index
    %143 = vector.load %arg4[%c0_91, %c0_92] : memref<128x16xbf16, #tpu.memory_space<vmem>>, vector<128x16xbf16>
    %c240 = arith.constant 240 : index
    %c0_93 = arith.constant 0 : index
    %144 = vector.load %arg5[%c240, %c0_93] : memref<288x16xbf16, #tpu.memory_space<vmem>>, vector<16x16xbf16>
    %cst_94 = arith.constant dense<0.000000e+00> : vector<128x16xf32>
    %145 = tpu.matmul %143, %144, %cst_94 {dimension_numbers = #tpu.dot_dimension_numbers<[1], [0], [0], [1], [0, 0, 1, 1], [], []>} : vector<128x16xbf16>, vector<16x16xbf16>, vector<128x16xf32> -> vector<128x16xf32>
    %146 = vector.extract_strided_slice %0 {offsets = [9, 0], sizes = [1, 16], strides = [1, 1]} : vector<13x16xf32> to vector<1x16xf32>
    %147 = vector.broadcast %146 : vector<1x16xf32> to vector<128x16xf32>
    %148 = arith.addf %145, %147 : vector<128x16xf32>
    %149 = arith.truncf %109 : vector<128x16xf32> to vector<128x16xbf16>
    %c0_95 = arith.constant 0 : index
    %c0_96 = arith.constant 0 : index
    %150 = vector.load %arg14[%c0_95, %c0_96] : memref<128x48xbf16, #tpu.memory_space<vmem>>, vector<128x16xbf16>
    tpu.vector_store %arg14[%c0_95, %c0_96], %149 {strides = array<i32>} : memref<128x48xbf16, #tpu.memory_space<vmem>>, vector<128x16xbf16>,
    %151 = arith.truncf %142 : vector<128x16xf32> to vector<128x16xbf16>
    %c0_97 = arith.constant 0 : index
    %c16_98 = arith.constant 16 : index
    %152 = vector.load %arg14[%c0_97, %c16_98] : memref<128x48xbf16, #tpu.memory_space<vmem>>, vector<128x16xbf16>
    tpu.vector_store %arg14[%c0_97, %c16_98], %151 {strides = array<i32>} : memref<128x48xbf16, #tpu.memory_space<vmem>>, vector<128x16xbf16>,
    %153 = arith.truncf %148 : vector<128x16xf32> to vector<128x16xbf16>
    %c0_99 = arith.constant 0 : index
    %c32_100 = arith.constant 32 : index
    %154 = vector.load %arg14[%c0_99, %c32_100] : memref<128x48xbf16, #tpu.memory_space<vmem>>, vector<128x16xbf16>
    tpu.vector_store %arg14[%c0_99, %c32_100], %153 {strides = array<i32>} : memref<128x48xbf16, #tpu.memory_space<vmem>>, vector<128x16xbf16>,
    %cst_101 = arith.constant 0.000000e+00 : bf16
    %155 = vector.broadcast %cst_101 : bf16 to vector<2x10x10x48xbf16>
    %c0_102 = arith.constant 0 : index
    %c0_103 = arith.constant 0 : index
    %c0_104 = arith.constant 0 : index
    %c0_105 = arith.constant 0 : index
    %156 = vector.load %arg11[%c0_102, %c0_103, %c0_104, %c0_105] : memref<2x10x10x48xbf16, #tpu.memory_space<vmem>>, vector<2x10x10x48xbf16>
    tpu.vector_store %arg11[%c0_102, %c0_103, %c0_104, %c0_105], %155 {strides = array<i32>} : memref<2x10x10x48xbf16, #tpu.memory_space<vmem>>, vector<2x10x10x48xbf16>,
    %c0_106 = arith.constant 0 : index
    %c0_107 = arith.constant 0 : index
    %157 = vector.load %arg14[%c0_106, %c0_107] : memref<128x48xbf16, #tpu.memory_space<vmem>>, vector<8x48xbf16>
    %c0_108 = arith.constant 0 : index
    %c1_109 = arith.constant 1 : index
    %c1_110 = arith.constant 1 : index
    %c0_111 = arith.constant 0 : index
    %158 = vector.load %arg11[%c0_108, %c1_109, %c1_110, %c0_111] : memref<2x10x10x48xbf16, #tpu.memory_space<vmem>>, vector<1x1x8x48xbf16>
    %159 = vector.shape_cast %158 : vector<1x1x8x48xbf16> to vector<8x48xbf16>
    %160 = vector.shape_cast %157 : vector<8x48xbf16> to vector<1x1x8x48xbf16>
    tpu.vector_store %arg11[%c0_108, %c1_109, %c1_110, %c0_111], %160 {strides = array<i32>} : memref<2x10x10x48xbf16, #tpu.memory_space<vmem>>, vector<1x1x8x48xbf16>,
    %c8 = arith.constant 8 : index
    %c0_112 = arith.constant 0 : index
    %161 = vector.load %arg14[%c8, %c0_112] : memref<128x48xbf16, #tpu.memory_space<vmem>>, vector<8x48xbf16>
    %c0_113 = arith.constant 0 : index
    %c2_114 = arith.constant 2 : index
    %c1_115 = arith.constant 1 : index
    %c0_116 = arith.constant 0 : index
    %162 = vector.load %arg11[%c0_113, %c2_114, %c1_115, %c0_116] : memref<2x10x10x48xbf16, #tpu.memory_space<vmem>>, vector<1x1x8x48xbf16>
    %163 = vector.shape_cast %162 : vector<1x1x8x48xbf16> to vector<8x48xbf16>
    %164 = vector.shape_cast %161 : vector<8x48xbf16> to vector<1x1x8x48xbf16>
    tpu.vector_store %arg11[%c0_113, %c2_114, %c1_115, %c0_116], %164 {strides = array<i32>} : memref<2x10x10x48xbf16, #tpu.memory_space<vmem>>, vector<1x1x8x48xbf16>,
    %c16_117 = arith.constant 16 : index
    %c0_118 = arith.constant 0 : index
    %165 = vector.load %arg14[%c16_117, %c0_118] : memref<128x48xbf16, #tpu.memory_space<vmem>>, vector<8x48xbf16>
    %c0_119 = arith.constant 0 : index
    %c3 = arith.constant 3 : index
    %c1_120 = arith.constant 1 : index
    %c0_121 = arith.constant 0 : index
    %166 = vector.load %arg11[%c0_119, %c3, %c1_120, %c0_121] : memref<2x10x10x48xbf16, #tpu.memory_space<vmem>>, vector<1x1x8x48xbf16>
    %167 = vector.shape_cast %166 : vector<1x1x8x48xbf16> to vector<8x48xbf16>
    %168 = vector.shape_cast %165 : vector<8x48xbf16> to vector<1x1x8x48xbf16>
    tpu.vector_store %arg11[%c0_119, %c3, %c1_120, %c0_121], %168 {strides = array<i32>} : memref<2x10x10x48xbf16, #tpu.memory_space<vmem>>, vector<1x1x8x48xbf16>,
    %c24 = arith.constant 24 : index
    %c0_122 = arith.constant 0 : index
    %169 = vector.load %arg14[%c24, %c0_122] : memref<128x48xbf16, #tpu.memory_space<vmem>>, vector<8x48xbf16>
    %c0_123 = arith.constant 0 : index
    %c4 = arith.constant 4 : index
    %c1_124 = arith.constant 1 : index
    %c0_125 = arith.constant 0 : index
    %170 = vector.load %arg11[%c0_123, %c4, %c1_124, %c0_125] : memref<2x10x10x48xbf16, #tpu.memory_space<vmem>>, vector<1x1x8x48xbf16>
    %171 = vector.shape_cast %170 : vector<1x1x8x48xbf16> to vector<8x48xbf16>
    %172 = vector.shape_cast %169 : vector<8x48xbf16> to vector<1x1x8x48xbf16>
    tpu.vector_store %arg11[%c0_123, %c4, %c1_124, %c0_125], %172 {strides = array<i32>} : memref<2x10x10x48xbf16, #tpu.memory_space<vmem>>, vector<1x1x8x48xbf16>,
    %c32_126 = arith.constant 32 : index
    %c0_127 = arith.constant 0 : index
    %173 = vector.load %arg14[%c32_126, %c0_127] : memref<128x48xbf16, #tpu.memory_space<vmem>>, vector<8x48xbf16>
    %c0_128 = arith.constant 0 : index
    %c5 = arith.constant 5 : index
    %c1_129 = arith.constant 1 : index
    %c0_130 = arith.constant 0 : index
    %174 = vector.load %arg11[%c0_128, %c5, %c1_129, %c0_130] : memref<2x10x10x48xbf16, #tpu.memory_space<vmem>>, vector<1x1x8x48xbf16>
    %175 = vector.shape_cast %174 : vector<1x1x8x48xbf16> to vector<8x48xbf16>
    %176 = vector.shape_cast %173 : vector<8x48xbf16> to vector<1x1x8x48xbf16>
    tpu.vector_store %arg11[%c0_128, %c5, %c1_129, %c0_130], %176 {strides = array<i32>} : memref<2x10x10x48xbf16, #tpu.memory_space<vmem>>, vector<1x1x8x48xbf16>,
    %c40 = arith.constant 40 : index
    %c0_131 = arith.constant 0 : index
    %177 = vector.load %arg14[%c40, %c0_131] : memref<128x48xbf16, #tpu.memory_space<vmem>>, vector<8x48xbf16>
    %c0_132 = arith.constant 0 : index
    %c6 = arith.constant 6 : index
    %c1_133 = arith.constant 1 : index
    %c0_134 = arith.constant 0 : index
    %178 = vector.load %arg11[%c0_132, %c6, %c1_133, %c0_134] : memref<2x10x10x48xbf16, #tpu.memory_space<vmem>>, vector<1x1x8x48xbf16>
    %179 = vector.shape_cast %178 : vector<1x1x8x48xbf16> to vector<8x48xbf16>
    %180 = vector.shape_cast %177 : vector<8x48xbf16> to vector<1x1x8x48xbf16>
    tpu.vector_store %arg11[%c0_132, %c6, %c1_133, %c0_134], %180 {strides = array<i32>} : memref<2x10x10x48xbf16, #tpu.memory_space<vmem>>, vector<1x1x8x48xbf16>,
    %c48_135 = arith.constant 48 : index
    %c0_136 = arith.constant 0 : index
    %181 = vector.load %arg14[%c48_135, %c0_136] : memref<128x48xbf16, #tpu.memory_space<vmem>>, vector<8x48xbf16>
    %c0_137 = arith.constant 0 : index
    %c7 = arith.constant 7 : index
    %c1_138 = arith.constant 1 : index
    %c0_139 = arith.constant 0 : index
    %182 = vector.load %arg11[%c0_137, %c7, %c1_138, %c0_139] : memref<2x10x10x48xbf16, #tpu.memory_space<vmem>>, vector<1x1x8x48xbf16>
    %183 = vector.shape_cast %182 : vector<1x1x8x48xbf16> to vector<8x48xbf16>
    %184 = vector.shape_cast %181 : vector<8x48xbf16> to vector<1x1x8x48xbf16>
    tpu.vector_store %arg11[%c0_137, %c7, %c1_138, %c0_139], %184 {strides = array<i32>} : memref<2x10x10x48xbf16, #tpu.memory_space<vmem>>, vector<1x1x8x48xbf16>,
    %c56 = arith.constant 56 : index
    %c0_140 = arith.constant 0 : index
    %185 = vector.load %arg14[%c56, %c0_140] : memref<128x48xbf16, #tpu.memory_space<vmem>>, vector<8x48xbf16>
    %c0_141 = arith.constant 0 : index
    %c8_142 = arith.constant 8 : index
    %c1_143 = arith.constant 1 : index
    %c0_144 = arith.constant 0 : index
    %186 = vector.load %arg11[%c0_141, %c8_142, %c1_143, %c0_144] : memref<2x10x10x48xbf16, #tpu.memory_space<vmem>>, vector<1x1x8x48xbf16>
    %187 = vector.shape_cast %186 : vector<1x1x8x48xbf16> to vector<8x48xbf16>
    %188 = vector.shape_cast %185 : vector<8x48xbf16> to vector<1x1x8x48xbf16>
    tpu.vector_store %arg11[%c0_141, %c8_142, %c1_143, %c0_144], %188 {strides = array<i32>} : memref<2x10x10x48xbf16, #tpu.memory_space<vmem>>, vector<1x1x8x48xbf16>,
    %c64_145 = arith.constant 64 : index
    %c0_146 = arith.constant 0 : index
    %189 = vector.load %arg14[%c64_145, %c0_146] : memref<128x48xbf16, #tpu.memory_space<vmem>>, vector<8x48xbf16>
    %c1_147 = arith.constant 1 : index
    %c1_148 = arith.constant 1 : index
    %c1_149 = arith.constant 1 : index
    %c0_150 = arith.constant 0 : index
    %190 = vector.load %arg11[%c1_147, %c1_148, %c1_149, %c0_150] : memref<2x10x10x48xbf16, #tpu.memory_space<vmem>>, vector<1x1x8x48xbf16>
    %191 = vector.shape_cast %190 : vector<1x1x8x48xbf16> to vector<8x48xbf16>
    %192 = vector.shape_cast %189 : vector<8x48xbf16> to vector<1x1x8x48xbf16>
    tpu.vector_store %arg11[%c1_147, %c1_148, %c1_149, %c0_150], %192 {strides = array<i32>} : memref<2x10x10x48xbf16, #tpu.memory_space<vmem>>, vector<1x1x8x48xbf16>,
    %c72 = arith.constant 72 : index
    %c0_151 = arith.constant 0 : index
    %193 = vector.load %arg14[%c72, %c0_151] : memref<128x48xbf16, #tpu.memory_space<vmem>>, vector<8x48xbf16>
    %c1_152 = arith.constant 1 : index
    %c2_153 = arith.constant 2 : index
    %c1_154 = arith.constant 1 : index
    %c0_155 = arith.constant 0 : index
    %194 = vector.load %arg11[%c1_152, %c2_153, %c1_154, %c0_155] : memref<2x10x10x48xbf16, #tpu.memory_space<vmem>>, vector<1x1x8x48xbf16>
    %195 = vector.shape_cast %194 : vector<1x1x8x48xbf16> to vector<8x48xbf16>
    %196 = vector.shape_cast %193 : vector<8x48xbf16> to vector<1x1x8x48xbf16>
    tpu.vector_store %arg11[%c1_152, %c2_153, %c1_154, %c0_155], %196 {strides = array<i32>} : memref<2x10x10x48xbf16, #tpu.memory_space<vmem>>, vector<1x1x8x48xbf16>,
    %c80_156 = arith.constant 80 : index
    %c0_157 = arith.constant 0 : index
    %197 = vector.load %arg14[%c80_156, %c0_157] : memref<128x48xbf16, #tpu.memory_space<vmem>>, vector<8x48xbf16>
    %c1_158 = arith.constant 1 : index
    %c3_159 = arith.constant 3 : index
    %c1_160 = arith.constant 1 : index
    %c0_161 = arith.constant 0 : index
    %198 = vector.load %arg11[%c1_158, %c3_159, %c1_160, %c0_161] : memref<2x10x10x48xbf16, #tpu.memory_space<vmem>>, vector<1x1x8x48xbf16>
    %199 = vector.shape_cast %198 : vector<1x1x8x48xbf16> to vector<8x48xbf16>
    %200 = vector.shape_cast %197 : vector<8x48xbf16> to vector<1x1x8x48xbf16>
    tpu.vector_store %arg11[%c1_158, %c3_159, %c1_160, %c0_161], %200 {strides = array<i32>} : memref<2x10x10x48xbf16, #tpu.memory_space<vmem>>, vector<1x1x8x48xbf16>,
    %c88 = arith.constant 88 : index
    %c0_162 = arith.constant 0 : index
    %201 = vector.load %arg14[%c88, %c0_162] : memref<128x48xbf16, #tpu.memory_space<vmem>>, vector<8x48xbf16>
    %c1_163 = arith.constant 1 : index
    %c4_164 = arith.constant 4 : index
    %c1_165 = arith.constant 1 : index
    %c0_166 = arith.constant 0 : index
    %202 = vector.load %arg11[%c1_163, %c4_164, %c1_165, %c0_166] : memref<2x10x10x48xbf16, #tpu.memory_space<vmem>>, vector<1x1x8x48xbf16>
    %203 = vector.shape_cast %202 : vector<1x1x8x48xbf16> to vector<8x48xbf16>
    %204 = vector.shape_cast %201 : vector<8x48xbf16> to vector<1x1x8x48xbf16>
    tpu.vector_store %arg11[%c1_163, %c4_164, %c1_165, %c0_166], %204 {strides = array<i32>} : memref<2x10x10x48xbf16, #tpu.memory_space<vmem>>, vector<1x1x8x48xbf16>,
    %c96_167 = arith.constant 96 : index
    %c0_168 = arith.constant 0 : index
    %205 = vector.load %arg14[%c96_167, %c0_168] : memref<128x48xbf16, #tpu.memory_space<vmem>>, vector<8x48xbf16>
    %c1_169 = arith.constant 1 : index
    %c5_170 = arith.constant 5 : index
    %c1_171 = arith.constant 1 : index
    %c0_172 = arith.constant 0 : index
    %206 = vector.load %arg11[%c1_169, %c5_170, %c1_171, %c0_172] : memref<2x10x10x48xbf16, #tpu.memory_space<vmem>>, vector<1x1x8x48xbf16>
    %207 = vector.shape_cast %206 : vector<1x1x8x48xbf16> to vector<8x48xbf16>
    %208 = vector.shape_cast %205 : vector<8x48xbf16> to vector<1x1x8x48xbf16>
    tpu.vector_store %arg11[%c1_169, %c5_170, %c1_171, %c0_172], %208 {strides = array<i32>} : memref<2x10x10x48xbf16, #tpu.memory_space<vmem>>, vector<1x1x8x48xbf16>,
    %c104 = arith.constant 104 : index
    %c0_173 = arith.constant 0 : index
    %209 = vector.load %arg14[%c104, %c0_173] : memref<128x48xbf16, #tpu.memory_space<vmem>>, vector<8x48xbf16>
    %c1_174 = arith.constant 1 : index
    %c6_175 = arith.constant 6 : index
    %c1_176 = arith.constant 1 : index
    %c0_177 = arith.constant 0 : index
    %210 = vector.load %arg11[%c1_174, %c6_175, %c1_176, %c0_177] : memref<2x10x10x48xbf16, #tpu.memory_space<vmem>>, vector<1x1x8x48xbf16>
    %211 = vector.shape_cast %210 : vector<1x1x8x48xbf16> to vector<8x48xbf16>
    %212 = vector.shape_cast %209 : vector<8x48xbf16> to vector<1x1x8x48xbf16>
    tpu.vector_store %arg11[%c1_174, %c6_175, %c1_176, %c0_177], %212 {strides = array<i32>} : memref<2x10x10x48xbf16, #tpu.memory_space<vmem>>, vector<1x1x8x48xbf16>,
    %c112_178 = arith.constant 112 : index
    %c0_179 = arith.constant 0 : index
    %213 = vector.load %arg14[%c112_178, %c0_179] : memref<128x48xbf16, #tpu.memory_space<vmem>>, vector<8x48xbf16>
    %c1_180 = arith.constant 1 : index
    %c7_181 = arith.constant 7 : index
    %c1_182 = arith.constant 1 : index
    %c0_183 = arith.constant 0 : index
    %214 = vector.load %arg11[%c1_180, %c7_181, %c1_182, %c0_183] : memref<2x10x10x48xbf16, #tpu.memory_space<vmem>>, vector<1x1x8x48xbf16>
    %215 = vector.shape_cast %214 : vector<1x1x8x48xbf16> to vector<8x48xbf16>
    %216 = vector.shape_cast %213 : vector<8x48xbf16> to vector<1x1x8x48xbf16>
    tpu.vector_store %arg11[%c1_180, %c7_181, %c1_182, %c0_183], %216 {strides = array<i32>} : memref<2x10x10x48xbf16, #tpu.memory_space<vmem>>, vector<1x1x8x48xbf16>,
    %c120 = arith.constant 120 : index
    %c0_184 = arith.constant 0 : index
    %217 = vector.load %arg14[%c120, %c0_184] : memref<128x48xbf16, #tpu.memory_space<vmem>>, vector<8x48xbf16>
    %c1_185 = arith.constant 1 : index
    %c8_186 = arith.constant 8 : index
    %c1_187 = arith.constant 1 : index
    %c0_188 = arith.constant 0 : index
    %218 = vector.load %arg11[%c1_185, %c8_186, %c1_187, %c0_188] : memref<2x10x10x48xbf16, #tpu.memory_space<vmem>>, vector<1x1x8x48xbf16>
    %219 = vector.shape_cast %218 : vector<1x1x8x48xbf16> to vector<8x48xbf16>
    %220 = vector.shape_cast %217 : vector<8x48xbf16> to vector<1x1x8x48xbf16>
    tpu.vector_store %arg11[%c1_185, %c8_186, %c1_187, %c0_188], %220 {strides = array<i32>} : memref<2x10x10x48xbf16, #tpu.memory_space<vmem>>, vector<1x1x8x48xbf16>,
    %c0_189 = arith.constant 0 : index
    %c0_190 = arith.constant 0 : index
    %c0_191 = arith.constant 0 : index
    %c0_192 = arith.constant 0 : index
    %221 = vector.load %arg11[%c0_189, %c0_190, %c0_191, %c0_192] : memref<2x10x10x48xbf16, #tpu.memory_space<vmem>>, vector<2x8x8x48xbf16>
    %222 = vector.shape_cast %221 : vector<2x8x8x48xbf16> to vector<128x48xbf16>
    %c0_193 = arith.constant 0 : index
    %c0_194 = arith.constant 0 : index
    %223 = vector.load %arg13[%c0_193, %c0_194] : memref<128x432xbf16, #tpu.memory_space<vmem>>, vector<128x48xbf16>
    tpu.vector_store %arg13[%c0_193, %c0_194], %222 {strides = array<i32>} : memref<128x432xbf16, #tpu.memory_space<vmem>>, vector<128x48xbf16>,
    %c0_195 = arith.constant 0 : index
    %c0_196 = arith.constant 0 : index
    %c1_197 = arith.constant 1 : index
    %c0_198 = arith.constant 0 : index
    %224 = vector.load %arg11[%c0_195, %c0_196, %c1_197, %c0_198] : memref<2x10x10x48xbf16, #tpu.memory_space<vmem>>, vector<2x8x8x48xbf16>
    %225 = vector.shape_cast %224 : vector<2x8x8x48xbf16> to vector<128x48xbf16>
    %c0_199 = arith.constant 0 : index
    %c48_200 = arith.constant 48 : index
    %226 = vector.load %arg13[%c0_199, %c48_200] : memref<128x432xbf16, #tpu.memory_space<vmem>>, vector<128x48xbf16>
    tpu.vector_store %arg13[%c0_199, %c48_200], %225 {strides = array<i32>} : memref<128x432xbf16, #tpu.memory_space<vmem>>, vector<128x48xbf16>,
    %c0_201 = arith.constant 0 : index
    %c0_202 = arith.constant 0 : index
    %c2_203 = arith.constant 2 : index
    %c0_204 = arith.constant 0 : index
    %227 = vector.load %arg11[%c0_201, %c0_202, %c2_203, %c0_204] : memref<2x10x10x48xbf16, #tpu.memory_space<vmem>>, vector<2x8x8x48xbf16>
    %228 = vector.shape_cast %227 : vector<2x8x8x48xbf16> to vector<128x48xbf16>
    %c0_205 = arith.constant 0 : index
    %c96_206 = arith.constant 96 : index
    %229 = vector.load %arg13[%c0_205, %c96_206] : memref<128x432xbf16, #tpu.memory_space<vmem>>, vector<128x48xbf16>
    tpu.vector_store %arg13[%c0_205, %c96_206], %228 {strides = array<i32>} : memref<128x432xbf16, #tpu.memory_space<vmem>>, vector<128x48xbf16>,
    %c0_207 = arith.constant 0 : index
    %c1_208 = arith.constant 1 : index
    %c0_209 = arith.constant 0 : index
    %c0_210 = arith.constant 0 : index
    %230 = vector.load %arg11[%c0_207, %c1_208, %c0_209, %c0_210] : memref<2x10x10x48xbf16, #tpu.memory_space<vmem>>, vector<2x8x8x48xbf16>
    %231 = vector.shape_cast %230 : vector<2x8x8x48xbf16> to vector<128x48xbf16>
    %c0_211 = arith.constant 0 : index
    %c144_212 = arith.constant 144 : index
    %232 = vector.load %arg13[%c0_211, %c144_212] : memref<128x432xbf16, #tpu.memory_space<vmem>>, vector<128x48xbf16>
    tpu.vector_store %arg13[%c0_211, %c144_212], %231 {strides = array<i32>} : memref<128x432xbf16, #tpu.memory_space<vmem>>, vector<128x48xbf16>,
    %c0_213 = arith.constant 0 : index
    %c1_214 = arith.constant 1 : index
    %c1_215 = arith.constant 1 : index
    %c0_216 = arith.constant 0 : index
    %233 = vector.load %arg11[%c0_213, %c1_214, %c1_215, %c0_216] : memref<2x10x10x48xbf16, #tpu.memory_space<vmem>>, vector<2x8x8x48xbf16>
    %234 = vector.shape_cast %233 : vector<2x8x8x48xbf16> to vector<128x48xbf16>
    %c0_217 = arith.constant 0 : index
    %c192_218 = arith.constant 192 : index
    %235 = vector.load %arg13[%c0_217, %c192_218] : memref<128x432xbf16, #tpu.memory_space<vmem>>, vector<128x48xbf16>
    tpu.vector_store %arg13[%c0_217, %c192_218], %234 {strides = array<i32>} : memref<128x432xbf16, #tpu.memory_space<vmem>>, vector<128x48xbf16>,
    %c0_219 = arith.constant 0 : index
    %c1_220 = arith.constant 1 : index
    %c2_221 = arith.constant 2 : index
    %c0_222 = arith.constant 0 : index
    %236 = vector.load %arg11[%c0_219, %c1_220, %c2_221, %c0_222] : memref<2x10x10x48xbf16, #tpu.memory_space<vmem>>, vector<2x8x8x48xbf16>
    %237 = vector.shape_cast %236 : vector<2x8x8x48xbf16> to vector<128x48xbf16>
    %c0_223 = arith.constant 0 : index
    %c240_224 = arith.constant 240 : index
    %238 = vector.load %arg13[%c0_223, %c240_224] : memref<128x432xbf16, #tpu.memory_space<vmem>>, vector<128x48xbf16>
    tpu.vector_store %arg13[%c0_223, %c240_224], %237 {strides = array<i32>} : memref<128x432xbf16, #tpu.memory_space<vmem>>, vector<128x48xbf16>,
    %c0_225 = arith.constant 0 : index
    %c2_226 = arith.constant 2 : index
    %c0_227 = arith.constant 0 : index
    %c0_228 = arith.constant 0 : index
    %239 = vector.load %arg11[%c0_225, %c2_226, %c0_227, %c0_228] : memref<2x10x10x48xbf16, #tpu.memory_space<vmem>>, vector<2x8x8x48xbf16>
    %240 = vector.shape_cast %239 : vector<2x8x8x48xbf16> to vector<128x48xbf16>
    %c0_229 = arith.constant 0 : index
    %c288 = arith.constant 288 : index
    %241 = vector.load %arg13[%c0_229, %c288] : memref<128x432xbf16, #tpu.memory_space<vmem>>, vector<128x48xbf16>
    tpu.vector_store %arg13[%c0_229, %c288], %240 {strides = array<i32>} : memref<128x432xbf16, #tpu.memory_space<vmem>>, vector<128x48xbf16>,
    %c0_230 = arith.constant 0 : index
    %c2_231 = arith.constant 2 : index
    %c1_232 = arith.constant 1 : index
    %c0_233 = arith.constant 0 : index
    %242 = vector.load %arg11[%c0_230, %c2_231, %c1_232, %c0_233] : memref<2x10x10x48xbf16, #tpu.memory_space<vmem>>, vector<2x8x8x48xbf16>
    %243 = vector.shape_cast %242 : vector<2x8x8x48xbf16> to vector<128x48xbf16>
    %c0_234 = arith.constant 0 : index
    %c336 = arith.constant 336 : index
    %244 = vector.load %arg13[%c0_234, %c336] : memref<128x432xbf16, #tpu.memory_space<vmem>>, vector<128x48xbf16>
    tpu.vector_store %arg13[%c0_234, %c336], %243 {strides = array<i32>} : memref<128x432xbf16, #tpu.memory_space<vmem>>, vector<128x48xbf16>,
    %c0_235 = arith.constant 0 : index
    %c2_236 = arith.constant 2 : index
    %c2_237 = arith.constant 2 : index
    %c0_238 = arith.constant 0 : index
    %245 = vector.load %arg11[%c0_235, %c2_236, %c2_237, %c0_238] : memref<2x10x10x48xbf16, #tpu.memory_space<vmem>>, vector<2x8x8x48xbf16>
    %246 = vector.shape_cast %245 : vector<2x8x8x48xbf16> to vector<128x48xbf16>
    %c0_239 = arith.constant 0 : index
    %c384 = arith.constant 384 : index
    %247 = vector.load %arg13[%c0_239, %c384] : memref<128x432xbf16, #tpu.memory_space<vmem>>, vector<128x48xbf16>
    tpu.vector_store %arg13[%c0_239, %c384], %246 {strides = array<i32>} : memref<128x432xbf16, #tpu.memory_space<vmem>>, vector<128x48xbf16>,
    %c0_240 = arith.constant 0 : index
    %c0_241 = arith.constant 0 : index
    %248 = vector.load %arg13[%c0_240, %c0_241] : memref<128x432xbf16, #tpu.memory_space<vmem>>, vector<128x432xbf16>
    %c0_242 = arith.constant 0 : index
    %c0_243 = arith.constant 0 : index
    %249 = vector.load %arg6[%c0_242, %c0_243] : memref<432x32xbf16, #tpu.memory_space<vmem>>, vector<432x32xbf16>
    %cst_244 = arith.constant dense<0.000000e+00> : vector<128x32xf32>
    %250 = tpu.matmul %248, %249, %cst_244 {dimension_numbers = #tpu.dot_dimension_numbers<[1], [0], [0], [1], [0, 0, 1, 1], [], []>} : vector<128x432xbf16>, vector<432x32xbf16>, vector<128x32xf32> -> vector<128x32xf32>
    %251 = vector.extract_strided_slice %1 {offsets = [0, 0], sizes = [1, 32], strides = [1, 1]} : vector<3x32xf32> to vector<1x32xf32>
    %252 = vector.broadcast %251 : vector<1x32xf32> to vector<128x32xf32>
    %253 = arith.addf %250, %252 : vector<128x32xf32>
    %cst_245 = arith.constant dense<0.000000e+00> : vector<32xf32>
    %254 = vector.multi_reduction <add>, %253, %cst_245 [0] : vector<128x32xf32> to vector<32xf32>
    %255 = vector.shape_cast %254 : vector<32xf32> to vector<1x32xf32>
    %cst_246 = arith.constant 1.280000e+02 : f32
    %256 = vector.broadcast %cst_246 : f32 to vector<1x32xf32>
    %257 = arith.divf %255, %256 : vector<1x32xf32>
    %258 = vector.broadcast %257 : vector<1x32xf32> to vector<128x32xf32>
    %259 = arith.subf %253, %258 : vector<128x32xf32>
    %260 = arith.mulf %259, %259 : vector<128x32xf32>
    %cst_247 = arith.constant dense<0.000000e+00> : vector<32xf32>
    %261 = vector.multi_reduction <add>, %260, %cst_247 [0] : vector<128x32xf32> to vector<32xf32>
    %262 = vector.shape_cast %261 : vector<32xf32> to vector<1x32xf32>
    %cst_248 = arith.constant 1.280000e+02 : f32
    %263 = vector.broadcast %cst_248 : f32 to vector<1x32xf32>
    %264 = arith.divf %262, %263 : vector<1x32xf32>
    %265 = vector.broadcast %257 : vector<1x32xf32> to vector<128x32xf32>
    %266 = arith.subf %253, %265 : vector<128x32xf32>
    %267 = vector.extract_strided_slice %1 {offsets = [1, 0], sizes = [1, 32], strides = [1, 1]} : vector<3x32xf32> to vector<1x32xf32>
    %cst_249 = arith.constant 9.99999974E-6 : f32
    %268 = vector.broadcast %cst_249 : f32 to vector<1x32xf32>
    %269 = arith.addf %264, %268 : vector<1x32xf32>
    %270 = math.rsqrt %269 : vector<1x32xf32>
    %271 = arith.mulf %267, %270 : vector<1x32xf32>
    %272 = vector.broadcast %271 : vector<1x32xf32> to vector<128x32xf32>
    %273 = arith.mulf %266, %272 : vector<128x32xf32>
    %274 = vector.extract_strided_slice %1 {offsets = [2, 0], sizes = [1, 32], strides = [1, 1]} : vector<3x32xf32> to vector<1x32xf32>
    %275 = vector.broadcast %274 : vector<1x32xf32> to vector<128x32xf32>
    %276 = arith.addf %273, %275 : vector<128x32xf32>
    %cst_250 = arith.constant 0.000000e+00 : f32
    %277 = vector.broadcast %cst_250 : f32 to vector<128x32xf32>
    %278 = arith.maximumf %276, %277 : vector<128x32xf32>
    %279 = arith.truncf %278 : vector<128x32xf32> to vector<128x32xbf16>
    %c256 = arith.constant 256 : index
    %c0_251 = arith.constant 0 : index
    %280 = vector.load %arg5[%c256, %c0_251] : memref<288x16xbf16, #tpu.memory_space<vmem>>, vector<32x16xbf16>
    %cst_252 = arith.constant dense<0.000000e+00> : vector<128x16xf32>
    %281 = tpu.matmul %279, %280, %cst_252 {dimension_numbers = #tpu.dot_dimension_numbers<[1], [0], [0], [1], [0, 0, 1, 1], [], []>} : vector<128x32xbf16>, vector<32x16xbf16>, vector<128x16xf32> -> vector<128x16xf32>
    %282 = vector.extract_strided_slice %0 {offsets = [10, 0], sizes = [1, 16], strides = [1, 1]} : vector<13x16xf32> to vector<1x16xf32>
    %283 = vector.broadcast %282 : vector<1x16xf32> to vector<128x16xf32>
    %284 = arith.addf %281, %283 : vector<128x16xf32>
    %cst_253 = arith.constant dense<0.000000e+00> : vector<16xf32>
    %285 = vector.multi_reduction <add>, %284, %cst_253 [0] : vector<128x16xf32> to vector<16xf32>
    %286 = vector.shape_cast %285 : vector<16xf32> to vector<1x16xf32>
    %cst_254 = arith.constant 1.280000e+02 : f32
    %287 = vector.broadcast %cst_254 : f32 to vector<1x16xf32>
    %288 = arith.divf %286, %287 : vector<1x16xf32>
    %289 = vector.broadcast %288 : vector<1x16xf32> to vector<128x16xf32>
    %290 = arith.subf %284, %289 : vector<128x16xf32>
    %291 = arith.mulf %290, %290 : vector<128x16xf32>
    %cst_255 = arith.constant dense<0.000000e+00> : vector<16xf32>
    %292 = vector.multi_reduction <add>, %291, %cst_255 [0] : vector<128x16xf32> to vector<16xf32>
    %293 = vector.shape_cast %292 : vector<16xf32> to vector<1x16xf32>
    %cst_256 = arith.constant 1.280000e+02 : f32
    %294 = vector.broadcast %cst_256 : f32 to vector<1x16xf32>
    %295 = arith.divf %293, %294 : vector<1x16xf32>
    %296 = vector.broadcast %288 : vector<1x16xf32> to vector<128x16xf32>
    %297 = arith.subf %284, %296 : vector<128x16xf32>
    %298 = vector.extract_strided_slice %0 {offsets = [11, 0], sizes = [1, 16], strides = [1, 1]} : vector<13x16xf32> to vector<1x16xf32>
    %cst_257 = arith.constant 9.99999974E-6 : f32
    %299 = vector.broadcast %cst_257 : f32 to vector<1x16xf32>
    %300 = arith.addf %295, %299 : vector<1x16xf32>
    %301 = math.rsqrt %300 : vector<1x16xf32>
    %302 = arith.mulf %298, %301 : vector<1x16xf32>
    %303 = vector.broadcast %302 : vector<1x16xf32> to vector<128x16xf32>
    %304 = arith.mulf %297, %303 : vector<128x16xf32>
    %305 = vector.extract_strided_slice %0 {offsets = [12, 0], sizes = [1, 16], strides = [1, 1]} : vector<13x16xf32> to vector<1x16xf32>
    %306 = vector.broadcast %305 : vector<1x16xf32> to vector<128x16xf32>
    %307 = arith.addf %304, %306 : vector<128x16xf32>
    %c0_258 = arith.constant 0 : index
    %c0_259 = arith.constant 0 : index
    %308 = vector.load %arg9[%c0_258, %c0_259] : memref<128x16xf32, #tpu.memory_space<vmem>>, vector<128x16xf32>
    tpu.vector_store %arg9[%c0_258, %c0_259], %307 {strides = array<i32>} : memref<128x16xf32, #tpu.memory_space<vmem>>, vector<128x16xf32>,
    return
  }
  func.func @transform_0(%arg0: i32) -> (i32, i32, i32, i32) {
    %c0_i32 = arith.constant 0 : i32
    %c0_i32_0 = arith.constant 0 : i32
    %c0_i32_1 = arith.constant 0 : i32
    %c0_i32_2 = arith.constant 0 : i32
    %c0_i32_3 = arith.constant 0 : i32
    return %c0_i32, %c0_i32_0, %c0_i32_1, %c0_i32_2 : i32, i32, i32, i32
  }
  func.func @transform_1(%arg0: i32) -> (i32, i32) {
    %c0_i32 = arith.constant 0 : i32
    %c0_i32_0 = arith.constant 0 : i32
    %c0_i32_1 = arith.constant 0 : i32
    return %c0_i32, %c0_i32_0 : i32, i32
  }
  func.func @transform_2(%arg0: i32) -> (i32, i32) {
    %c0_i32 = arith.constant 0 : i32
    %c0_i32_0 = arith.constant 0 : i32
    %c0_i32_1 = arith.constant 0 : i32
    return %c0_i32, %c0_i32_0 : i32, i32
  }
  func.func @transform_3(%arg0: i32) -> (i32, i32) {
    %c0_i32 = arith.constant 0 : i32
    %c0_i32_0 = arith.constant 0 : i32
    %c0_i32_1 = arith.constant 0 : i32
    return %c0_i32, %c0_i32_0 : i32, i32
  }
  func.func @transform_4(%arg0: i32) -> (i32, i32) {
    %c0_i32 = arith.constant 0 : i32
    %c0_i32_0 = arith.constant 0 : i32
    %c0_i32_1 = arith.constant 0 : i32
    return %c0_i32, %c0_i32_0 : i32, i32
  }
  func.func @transform_5(%arg0: i32) -> (i32, i32) {
    %c0_i32 = arith.constant 0 : i32
    %c0_i32_0 = arith.constant 0 : i32
    %c0_i32_1 = arith.constant 0 : i32
    return %c0_i32, %c0_i32_0 : i32, i32
  }
  func.func @transform_6(%arg0: i32) -> (i32, i32) {
    %c0_i32 = arith.constant 0 : i32
    %c0_i32_0 = arith.constant 0 : i32
    %c0_i32_1 = arith.constant 0 : i32
    return %c0_i32, %c0_i32_0 : i32, i32
  }
  func.func @transform_7(%arg0: i32) -> (i32, i32) {
    %c0_i32 = arith.constant 0 : i32
    %c0_i32_0 = arith.constant 0 : i32
    %c0_i32_1 = arith.constant 0 : i32
    return %c0_i32, %c0_i32_0 : i32, i32
  }
  func.func @transform_8(%arg0: i32) -> (i32, i32) {
    %c0_i32 = arith.constant 0 : i32
    %c0_i32_0 = arith.constant 0 : i32
    %c0_i32_1 = arith.constant 0 : i32
    return %c0_i32, %c0_i32_0 : i32, i32
  }
}

</mosaic_0001>

<bundles_post_ra>
// kernel: custom-call
= control target key start
LH: loop header
LB: loop body
LE: loop exit
PB: predicated region body
PF: predicated region fallthrough
CT: control target
= control target key end

     0   :  { %s6_s0 = inlined_call_operand.vmem [shape: f32[768], index: 0, kind: output, shape index: {}]  }

</bundles_post_ra>
